<compile_context>
chip_gen: v7x
topology: tpu7x:2x2x1
jax: 0.10.0
libtpu: 0.0.40
codegen_flags: <defaults>
</compile_context>

<pallas_src>
import functools
import math

import jax
import jax.numpy as jnp
from jax.experimental import pallas as pl
from jax.experimental.pallas import tpu as pltpu

EPS = 1e-5
VMEM_LIMIT_BYTES = 48 * 1024 * 1024   # <= ~48 MiB usage target; safe on v7x (64 MiB)

# Packed-parameter layout, single (18, 19) float32 array:
#   rows  0:10 -> [ W1 (10,17) | gamma1 (col 17) | beta1 (col 18) ]
#   rows 10:16 -> [ W2 (6,10)  | gamma2 (col 10) | beta2 (col 11) ]  cols 12.. unused
#   rows 16:18 -> [ W3 (2,6)   | b3     (col 6)  ]                   cols  7.. unused
P_ROWS, P_COLS = 18, 19


def _unpack_params(p_ref):
    w1 = p_ref[0:10, 0:17]            # (10, 17)
    g1 = p_ref[0:10, 17:18]           # (10, 1)
    be1 = p_ref[0:10, 18:19]          # (10, 1)
    w2 = p_ref[10:16, 0:10]           # (6, 10)
    g2 = p_ref[10:16, 10:11]          # (6, 1)
    be2 = p_ref[10:16, 11:12]         # (6, 1)
    w3 = p_ref[16:18, 0:6]            # (2, 6)
    b3 = p_ref[16:18, 6:7]            # (2, 1)
    return w1, g1, be1, w2, g2, be2, w3, b3


def _fc1_lanes(w1, x):
    # (10, 17) contracted with (T, 17) over the feature axis -> (10, T):
    # batch lands on lanes without any host- or kernel-side transpose of x.
    return jax.lax.dot_general(w1, x, (((1,), (1,)), ((), ())),
                               preferred_element_type=jnp.float32)


def _write_softmax(o_ref, logits):
    # 2-class softmax == sigmoid of the logit difference (no XLU max/sum).
    # Exact divide (no approx reciprocal) to hold the 2e-5 tolerance.
    d = logits[0:1, :] - logits[1:2, :]
    p0 = 1.0 / (1.0 + jnp.exp(-d))
    o_ref[0:1, :] = p0.astype(o_ref.dtype)
    o_ref[1:2, :] = (1.0 - p0).astype(o_ref.dtype)


# --------------------------------------------------------------------------
# Single-step fast path: whole batch in one tile, local two-pass BN stats.
# --------------------------------------------------------------------------
def _classifier_fused_kernel(x_ref, p_ref, o_ref, *, n_rows):
    w1, g1, be1, w2, g2, be2, w3, b3 = _unpack_params(p_ref)
    inv_n = jnp.float32(1.0 / n_rows)

    x = x_ref[...].astype(jnp.float32)                       # (n, 17)
    h1 = _fc1_lanes(w1, x)                                   # (10, n)

    ones_row = jnp.ones((1, n_rows), jnp.float32)

    def lane_sum(m):
        # Per-feature sum over the (lane) batch axis on the MXU.
        return jax.lax.dot_general(m, ones_row, (((1,), (1,)), ((), ())),
                                   preferred_element_type=jnp.float32)

    def bn_relu(h, g, be):
        mu = lane_sum(h) * inv_n
        c = h - mu
        var = lane_sum(c * c) * inv_n                        # centered -> stable
        return jnp.maximum(g * jax.lax.rsqrt(var + EPS) * c + be, 0.0)

    a1 = bn_relu(h1, g1, be1)                                # (10, n)
    h2 = jnp.dot(w2, a1, preferred_element_type=jnp.float32) # (6, n)
    a2 = bn_relu(h2, g2, be2)                                # (6, n)
    logits = jnp.dot(w3, a2, preferred_element_type=jnp.float32) + b3
    _write_softmax(o_ref, logits)


# --------------------------------------------------------------------------
# Streaming path: 3-phase global BatchNorm over batch tiles.
#   phase 0: accumulate (shifted) stats of fc_1 output
#   phase 1: bn_1 + relu + fc_2, accumulate fc_2 stats
#   phase 2: full forward with global stats, write the output
# --------------------------------------------------------------------------
def _classifier_stream_kernel(x_ref, p_ref, o_ref,
                              sum1, sq1, k1, sum2, sq2, k2, *,
                              n_rows, tile_n, num_tiles, has_pad):
    phase = pl.program_id(0)
    j = pl.program_id(1)
    inv_n = jnp.float32(1.0 / n_rows)
    inv_t = jnp.float32(1.0 / tile_n)
    last = num_tiles - 1

    w1, g1, be1, w2, g2, be2, w3, b3 = _unpack_params(p_ref)

    x = x_ref[...].astype(jnp.float32)                       # (tile, 17)
    # fc_1 without bias (training-mode BN cancels it); batch on lanes.
    h1 = _fc1_lanes(w1, x)                                   # (10, tile)

    ones_row = jnp.ones((1, tile_n), jnp.float32)

    def lane_sum(m):
        return jax.lax.dot_general(m, ones_row, (((1,), (1,)), ((), ())),
                                   preferred_element_type=jnp.float32)

    def accumulate(h, k_ref, sum_ref, sq_ref):
        # Shifted sums: shift k = first-tile mean avoids catastrophic
        # cancellation in E[(h-k)^2] - (E[h-k])^2.
        hd = h - k_ref[...]
        sum_ref[...] += lane_sum(hd)
        sq_ref[...] += lane_sum(hd * hd)
        if has_pad:
            # Zero-padded batch columns exist only in the last tile: subtract
            # their contribution there instead of masking every tile.
            @pl.when(j == last)
            def _():
                col = j * tile_n + jax.lax.broadcasted_iota(
                    jnp.int32, (1, tile_n), 1)
                pad = (col >= n_rows).astype(jnp.float32)
                hp = hd * pad
                sum_ref[...] -= lane_sum(hp)
                sq_ref[...] -= lane_sum(hp * hp)

    def stats(k_ref, sum_ref, sq_ref):
        m = sum_ref[...] * inv_n
        mu = k_ref[...] + m
        var = sq_ref[...] * inv_n - m * m
        return mu, var

    def layer1_act():
        mu1, var1 = stats(k1, sum1, sq1)
        sc1 = g1 * jax.lax.rsqrt(var1 + EPS)                 # gamma folded in
        return jnp.maximum(sc1 * h1 + (be1 - sc1 * mu1), 0.0)  # (10, tile)

    # ---- phase 0: fc_1 output statistics ----------------------------------
    @pl.when(phase == 0)
    def _p0():
        @pl.when(j == 0)
        def _init():
            k1[...] = lane_sum(h1) * inv_t
            sum1[...] = jnp.zeros_like(sum1)
            sq1[...] = jnp.zeros_like(sq1)
            sum2[...] = jnp.zeros_like(sum2)
            sq2[...] = jnp.zeros_like(sq2)
        accumulate(h1, k1, sum1, sq1)

    # ---- phase 1: bn_1 + relu_1 + fc_2, fc_2 statistics --------------------
    @pl.when(phase == 1)
    def _p1():
        a1 = layer1_act()
        h2 = jnp.dot(w2, a1, preferred_element_type=jnp.float32)  # (6, tile)
        @pl.when(j == 0)
        def _():
            k2[...] = lane_sum(h2) * inv_t
        accumulate(h2, k2, sum2, sq2)

    # ---- phase 2: full forward with global stats, write the output ---------
    @pl.when(phase == 2)
    def _p2():
        a1 = layer1_act()
        h2 = jnp.dot(w2, a1, preferred_element_type=jnp.float32)
        mu2, var2 = stats(k2, sum2, sq2)
        sc2 = g2 * jax.lax.rsqrt(var2 + EPS)
        a2 = jnp.maximum(sc2 * h2 + (be2 - sc2 * mu2), 0.0)       # (6, tile)
        logits = jnp.dot(w3, a2, preferred_element_type=jnp.float32) + b3
        _write_softmax(o_ref, logits)


def classifier_forward(x, packed_params, *, tile_n=16384):
    """x: (N, 17). packed_params: (18, 19) float32 (see pack_params).

    Reproduces the PyTorch module's forward in *training-mode* BatchNorm
    semantics (per-batch statistics).  Returns (N, 2) float32 softmax probs.
    """
    n, f_in = x.shape
    assert f_in == 17 and n >= 1
    tile = max(128, -(-tile_n // 128) * 128)   # lane-dense output stores

    if n <= tile:
        # -------- single-step fast path: no padding, no host preprocessing --
        cost = pl.CostEstimate(
            flops=int(n * (2 * 17 * 10 + 2 * 10 * 6 + 2 * 6 * 2 + 150)),
            transcendentals=int(n + 64),
            bytes_accessed=int(n * 17 * 4 + n * 2 * 4 + P_ROWS * P_COLS * 4),
        )
        out_t = pl.pallas_call(
            functools.partial(_classifier_fused_kernel, n_rows=n),
            out_shape=jax.ShapeDtypeStruct((2, n), jnp.float32),
            grid=(1,),
            in_specs=[
                pl.BlockSpec((n, 17), lambda i: (0, 0)),
                pl.BlockSpec((P_ROWS, P_COLS), lambda i: (0, 0)),
            ],
            out_specs=pl.BlockSpec((2, n), lambda i: (0, 0)),
            compiler_params=pltpu.CompilerParams(
                dimension_semantics=("arbitrary",),
                vmem_limit_bytes=VMEM_LIMIT_BYTES,
            ),
            cost_estimate=cost,
        )(x, packed_params)
        return out_t.T

    # ------------- multi-tile streaming path --------------------------------
    num_tiles = pl.cdiv(n, tile)
    n_pad = num_tiles * tile
    # Only the ragged remainder needs zero rows (no transpose/relayout pass).
    x_pad = x if n_pad == n else jnp.pad(x, ((0, n_pad - n), (0, 0)))

    cost = pl.CostEstimate(
        flops=int(n_pad * (3 * 2 * 17 * 10 + 2 * 2 * 10 * 6 + 2 * 6 * 2 + 200)),
        transcendentals=int(n_pad + 64 * num_tiles),
        bytes_accessed=int(3 * n_pad * 17 * 4 + n_pad * 2 * 4
                           + P_ROWS * P_COLS * 4),
    )

    out_t = pl.pallas_call(
        functools.partial(_classifier_stream_kernel, n_rows=n, tile_n=tile,
                          num_tiles=num_tiles, has_pad=(n_pad != n)),
        out_shape=jax.ShapeDtypeStruct((2, n_pad), jnp.float32),
        grid=(3, num_tiles),
        in_specs=[
            pl.BlockSpec((tile, 17), lambda i, j: (j, 0)),        # streamed x
            pl.BlockSpec((P_ROWS, P_COLS), lambda i, j: (0, 0)),  # resident params
        ],
        # Output block index advances only during phase 2: no stale/garbage
        # writebacks and 2/3 less output write traffic.
        out_specs=pl.BlockSpec((2, tile), lambda i, j: (0, j * (i // 2))),
        scratch_shapes=[
            pltpu.VMEM((10, 1), jnp.float32),   # sum  of shifted fc_1 output
            pltpu.VMEM((10, 1), jnp.float32),   # sumsq of shifted fc_1 output
            pltpu.VMEM((10, 1), jnp.float32),   # shift k1 (first-tile mean)
            pltpu.VMEM((6, 1), jnp.float32),    # sum  of shifted fc_2 output
            pltpu.VMEM((6, 1), jnp.float32),    # sumsq of shifted fc_2 output
            pltpu.VMEM((6, 1), jnp.float32),    # shift k2 (first-tile mean)
        ],
        compiler_params=pltpu.CompilerParams(
            dimension_semantics=("arbitrary", "arbitrary"),
            vmem_limit_bytes=VMEM_LIMIT_BYTES,
        ),
        cost_estimate=cost,
    )(x_pad, packed_params)

    return out_t[:, :n].T


# ----------------------------- parameters ----------------------------------

def _kaiming_uniform(key, out_f, in_f):
    # PyTorch kaiming_uniform_(a=sqrt(5)) on a (out, in) Linear weight.
    gain = math.sqrt(2.0 / (1.0 + 5.0))
    bound = gain * math.sqrt(3.0 / in_f)
    return jax.random.uniform(key, (out_f, in_f), jnp.float32, -bound, bound)


def _bias(key, out_f, in_f):
    bound = 1.0 / math.sqrt(in_f)
    return jax.random.uniform(key, (out_f,), jnp.float32, -bound, bound)


def make_params(key):
    keys = jax.random.split(key, 6)
    return {
        "w1": _kaiming_uniform(keys[0], 10, 17), "b1": _bias(keys[3], 10, 17),
        "g1": jnp.ones((10,), jnp.float32), "be1": jnp.zeros((10,), jnp.float32),
        "w2": _kaiming_uniform(keys[1], 6, 10), "b2": _bias(keys[4], 6, 10),
        "g2": jnp.ones((6,), jnp.float32), "be2": jnp.zeros((6,), jnp.float32),
        "w3": _kaiming_uniform(keys[2], 2, 6), "b3": _bias(keys[5], 2, 6),
    }


def pack_params(params):
    # b1 / b2 are intentionally NOT packed: training-mode BN cancels them.
    p = jnp.zeros((P_ROWS, P_COLS), jnp.float32)
    p = p.at[0:10, 0:17].set(params["w1"])
    p = p.at[0:10, 17].set(params["g1"])
    p = p.at[0:10, 18].set(params["be1"])
    p = p.at[10:16, 0:10].set(params["w2"])
    p = p.at[10:16, 10].set(params["g2"])
    p = p.at[10:16, 11].set(params["be2"])
    p = p.at[16:18, 0:6].set(params["w3"])
    p = p.at[16:18, 6].set(params["b3"])
    return p


def reference_forward(x, params):
    # Pure-JAX reference with the exact PyTorch module semantics (incl. b1/b2).
    def bn(h, g, be):
        mu = jnp.mean(h, axis=0, keepdims=True)
        var = jnp.mean((h - mu) ** 2, axis=0, keepdims=True)
        return (h - mu) / jnp.sqrt(var + EPS) * g + be

    h = x @ params["w1"].T + params["b1"]
    h = jnp.maximum(bn(h, params["g1"], params["be1"]), 0.0)
    h = h @ params["w2"].T + params["b2"]
    h = jnp.maximum(bn(h, params["g2"], params["be2"]), 0.0)
    logits = h @ params["w3"].T + params["b3"]
    return jax.nn.softmax(logits, axis=-1)


if __name__ == "__main__":
    key = jax.random.PRNGKey(0)
    pkey, xkey1, xkey2, xkey3 = jax.random.split(key, 4)
    params = make_params(pkey)
    packed = pack_params(params)

    # 1) Tiny batch -> single-step fast path (no padding, one x DMA).
    N = 8
    x = jax.random.normal(xkey1, (N, 17), jnp.float32)
    out = jax.block_until_ready(classifier_forward(x, packed))
    ref = reference_forward(x, params)
    assert out.shape == (N, 2)
    assert jnp.allclose(out, ref, atol=2e-5, rtol=2e-5), "mismatch (fast path)"
    assert jnp.allclose(jnp.sum(out, axis=-1), 1.0, atol=1e-5)

    # 2) Ragged multi-tile batch (cross-tile BN stats + last-tile pad handling).
    N2 = 300
    x2 = jax.random.normal(xkey2, (N2, 17), jnp.float32)
    out2 = jax.block_until_ready(classifier_forward(x2, packed, tile_n=128))
    ref2 = reference_forward(x2, params)
    assert out2.shape == (N2, 2)
    assert jnp.allclose(out2, ref2, atol=2e-5, rtol=2e-5), "mismatch (ragged)"
    assert jnp.allclose(jnp.sum(out2, axis=-1), 1.0, atol=1e-5)

    # 3) Exactly-divisible multi-tile batch (no host pad at all).
    N3 = 1024
    x3 = jax.random.normal(xkey3, (N3, 17), jnp.float32)
    out3 = jax.block_until_ready(classifier_forward(x3, packed, tile_n=256))
    ref3 = reference_forward(x3, params)
    assert out3.shape == (N3, 2)
    assert jnp.allclose(out3, ref3, atol=2e-5, rtol=2e-5), "mismatch (multi-tile)"
    assert jnp.allclose(jnp.sum(out3, axis=-1), 1.0, atol=1e-5)

    print("KERNEL_OK")
</pallas_src>

<mosaic_0001>
module attributes {stable_mosaic.version = 11 : i64} {
  func.func @_classifier_fused_kernel(%arg0: i32, %arg1: memref<8x17xf32, #tpu.memory_space<vmem>>, %arg2: memref<18x19xf32, #tpu.memory_space<vmem>>, %arg3: memref<2x8xf32, #tpu.memory_space<vmem>>) attributes {dimension_semantics = [#tpu.dimension_semantics<arbitrary>], iteration_bounds = array<i64: 1>, scalar_prefetch = 0 : i64, scratch_operands = 0 : i64, tpu.core_type = #tpu.core_type<tc>, window_params = [{pipeline_mode = #tpu.pipeline_mode<synchronous>, transform_indices = @transform_0, window_bounds = array<i64: 8, 17>}, {pipeline_mode = #tpu.pipeline_mode<synchronous>, transform_indices = @transform_1, window_bounds = array<i64: 18, 19>}, {pipeline_mode = #tpu.pipeline_mode<synchronous>, transform_indices = @transform_2, window_bounds = array<i64: 2, 8>}]} {
    %c0 = arith.constant 0 : index
    %c0_0 = arith.constant 0 : index
    %0 = vector.load %arg2[%c0, %c0_0] : memref<18x19xf32, #tpu.memory_space<vmem>>, vector<10x17xf32>
    %c0_1 = arith.constant 0 : index
    %c17 = arith.constant 17 : index
    %1 = vector.load %arg2[%c0_1, %c17] : memref<18x19xf32, #tpu.memory_space<vmem>>, vector<10x1xf32>
    %c0_2 = arith.constant 0 : index
    %c18 = arith.constant 18 : index
    %2 = vector.load %arg2[%c0_2, %c18] : memref<18x19xf32, #tpu.memory_space<vmem>>, vector<10x1xf32>
    %c10 = arith.constant 10 : index
    %c0_3 = arith.constant 0 : index
    %3 = vector.load %arg2[%c10, %c0_3] : memref<18x19xf32, #tpu.memory_space<vmem>>, vector<6x10xf32>
    %c10_4 = arith.constant 10 : index
    %c10_5 = arith.constant 10 : index
    %4 = vector.load %arg2[%c10_4, %c10_5] : memref<18x19xf32, #tpu.memory_space<vmem>>, vector<6x1xf32>
    %c10_6 = arith.constant 10 : index
    %c11 = arith.constant 11 : index
    %5 = vector.load %arg2[%c10_6, %c11] : memref<18x19xf32, #tpu.memory_space<vmem>>, vector<6x1xf32>
    %c16 = arith.constant 16 : index
    %c0_7 = arith.constant 0 : index
    %6 = vector.load %arg2[%c16, %c0_7] : memref<18x19xf32, #tpu.memory_space<vmem>>, vector<2x6xf32>
    %c16_8 = arith.constant 16 : index
    %c6 = arith.constant 6 : index
    %7 = vector.load %arg2[%c16_8, %c6] : memref<18x19xf32, #tpu.memory_space<vmem>>, vector<2x1xf32>
    %c0_9 = arith.constant 0 : index
    %c0_10 = arith.constant 0 : index
    %8 = vector.load %arg1[%c0_9, %c0_10] : memref<8x17xf32, #tpu.memory_space<vmem>>, vector<8x17xf32>
    %cst = arith.constant dense<0.000000e+00> : vector<10x8xf32>
    %9 = tpu.matmul %0, %8, %cst {dimension_numbers = #tpu.dot_dimension_numbers<[1], [1], [0], [0], [0, 0, 1, 0], [], []>} : vector<10x17xf32>, vector<8x17xf32>, vector<10x8xf32> -> vector<10x8xf32>
    %cst_11 = arith.constant 1.000000e+00 : f32
    %10 = vector.broadcast %cst_11 : f32 to vector<1x8xf32>
    %cst_12 = arith.constant dense<0.000000e+00> : vector<10x1xf32>
    %11 = tpu.matmul %9, %10, %cst_12 {dimension_numbers = #tpu.dot_dimension_numbers<[1], [1], [0], [0], [0, 0, 1, 0], [], []>} : vector<10x8xf32>, vector<1x8xf32>, vector<10x1xf32> -> vector<10x1xf32>
    %cst_13 = arith.constant 1.250000e-01 : f32
    %12 = vector.broadcast %cst_13 : f32 to vector<10x1xf32>
    %13 = arith.mulf %11, %12 : vector<10x1xf32>
    %14 = vector.broadcast %13 : vector<10x1xf32> to vector<10x8xf32>
    %15 = arith.subf %9, %14 : vector<10x8xf32>
    %16 = arith.mulf %15, %15 : vector<10x8xf32>
    %cst_14 = arith.constant dense<0.000000e+00> : vector<10x1xf32>
    %17 = tpu.matmul %16, %10, %cst_14 {dimension_numbers = #tpu.dot_dimension_numbers<[1], [1], [0], [0], [0, 0, 1, 0], [], []>} : vector<10x8xf32>, vector<1x8xf32>, vector<10x1xf32> -> vector<10x1xf32>
    %cst_15 = arith.constant 1.250000e-01 : f32
    %18 = vector.broadcast %cst_15 : f32 to vector<10x1xf32>
    %19 = arith.mulf %17, %18 : vector<10x1xf32>
    %cst_16 = arith.constant 9.99999974E-6 : f32
    %20 = vector.broadcast %cst_16 : f32 to vector<10x1xf32>
    %21 = arith.addf %19, %20 : vector<10x1xf32>
    %22 = math.rsqrt %21 : vector<10x1xf32>
    %23 = arith.mulf %1, %22 : vector<10x1xf32>
    %24 = vector.broadcast %23 : vector<10x1xf32> to vector<10x8xf32>
    %25 = arith.mulf %24, %15 : vector<10x8xf32>
    %26 = vector.broadcast %2 : vector<10x1xf32> to vector<10x8xf32>
    %27 = arith.addf %25, %26 : vector<10x8xf32>
    %cst_17 = arith.constant 0.000000e+00 : f32
    %28 = vector.broadcast %cst_17 : f32 to vector<10x8xf32>
    %29 = arith.maximumf %27, %28 : vector<10x8xf32>
    %cst_18 = arith.constant dense<0.000000e+00> : vector<6x8xf32>
    %30 = tpu.matmul %3, %29, %cst_18 {dimension_numbers = #tpu.dot_dimension_numbers<[1], [0], [0], [1], [0, 0, 1, 1], [], []>} : vector<6x10xf32>, vector<10x8xf32>, vector<6x8xf32> -> vector<6x8xf32>
    %cst_19 = arith.constant dense<0.000000e+00> : vector<6x1xf32>
    %31 = tpu.matmul %30, %10, %cst_19 {dimension_numbers = #tpu.dot_dimension_numbers<[1], [1], [0], [0], [0, 0, 1, 0], [], []>} : vector<6x8xf32>, vector<1x8xf32>, vector<6x1xf32> -> vector<6x1xf32>
    %cst_20 = arith.constant 1.250000e-01 : f32
    %32 = vector.broadcast %cst_20 : f32 to vector<6x1xf32>
    %33 = arith.mulf %31, %32 : vector<6x1xf32>
    %34 = vector.broadcast %33 : vector<6x1xf32> to vector<6x8xf32>
    %35 = arith.subf %30, %34 : vector<6x8xf32>
    %36 = arith.mulf %35, %35 : vector<6x8xf32>
    %cst_21 = arith.constant dense<0.000000e+00> : vector<6x1xf32>
    %37 = tpu.matmul %36, %10, %cst_21 {dimension_numbers = #tpu.dot_dimension_numbers<[1], [1], [0], [0], [0, 0, 1, 0], [], []>} : vector<6x8xf32>, vector<1x8xf32>, vector<6x1xf32> -> vector<6x1xf32>
    %cst_22 = arith.constant 1.250000e-01 : f32
    %38 = vector.broadcast %cst_22 : f32 to vector<6x1xf32>
    %39 = arith.mulf %37, %38 : vector<6x1xf32>
    %cst_23 = arith.constant 9.99999974E-6 : f32
    %40 = vector.broadcast %cst_23 : f32 to vector<6x1xf32>
    %41 = arith.addf %39, %40 : vector<6x1xf32>
    %42 = math.rsqrt %41 : vector<6x1xf32>
    %43 = arith.mulf %4, %42 : vector<6x1xf32>
    %44 = vector.broadcast %43 : vector<6x1xf32> to vector<6x8xf32>
    %45 = arith.mulf %44, %35 : vector<6x8xf32>
    %46 = vector.broadcast %5 : vector<6x1xf32> to vector<6x8xf32>
    %47 = arith.addf %45, %46 : vector<6x8xf32>
    %cst_24 = arith.constant 0.000000e+00 : f32
    %48 = vector.broadcast %cst_24 : f32 to vector<6x8xf32>
    %49 = arith.maximumf %47, %48 : vector<6x8xf32>
    %cst_25 = arith.constant dense<0.000000e+00> : vector<2x8xf32>
    %50 = tpu.matmul %6, %49, %cst_25 {dimension_numbers = #tpu.dot_dimension_numbers<[1], [0], [0], [1], [0, 0, 1, 1], [], []>} : vector<2x6xf32>, vector<6x8xf32>, vector<2x8xf32> -> vector<2x8xf32>
    %51 = vector.broadcast %7 : vector<2x1xf32> to vector<2x8xf32>
    %52 = arith.addf %50, %51 : vector<2x8xf32>
    %53 = vector.extract_strided_slice %52 {offsets = [0, 0], sizes = [1, 8], strides = [1, 1]} : vector<2x8xf32> to vector<1x8xf32>
    %54 = vector.extract_strided_slice %52 {offsets = [1, 0], sizes = [1, 8], strides = [1, 1]} : vector<2x8xf32> to vector<1x8xf32>
    %55 = arith.subf %53, %54 : vector<1x8xf32>
    %cst_26 = arith.constant 0.000000e+00 : f32
    %56 = vector.broadcast %cst_26 : f32 to vector<1x8xf32>
    %57 = arith.subf %56, %55 : vector<1x8xf32>
    %58 = math.exp %57 : vector<1x8xf32>
    %cst_27 = arith.constant 1.000000e+00 : f32
    %59 = vector.broadcast %cst_27 : f32 to vector<1x8xf32>
    %60 = arith.addf %59, %58 : vector<1x8xf32>
    %cst_28 = arith.constant 1.000000e+00 : f32
    %61 = vector.broadcast %cst_28 : f32 to vector<1x8xf32>
    %62 = arith.divf %61, %60 : vector<1x8xf32>
    %c0_29 = arith.constant 0 : index
    %c0_30 = arith.constant 0 : index
    %63 = vector.load %arg3[%c0_29, %c0_30] : memref<2x8xf32, #tpu.memory_space<vmem>>, vector<1x8xf32>
    tpu.vector_store %arg3[%c0_29, %c0_30], %62 {strides = array<i32>} : memref<2x8xf32, #tpu.memory_space<vmem>>, vector<1x8xf32>,
    %cst_31 = arith.constant 1.000000e+00 : f32
    %64 = vector.broadcast %cst_31 : f32 to vector<1x8xf32>
    %65 = arith.subf %64, %62 : vector<1x8xf32>
    %c1 = arith.constant 1 : index
    %c0_32 = arith.constant 0 : index
    %66 = vector.load %arg3[%c1, %c0_32] : memref<2x8xf32, #tpu.memory_space<vmem>>, vector<1x8xf32>
    tpu.vector_store %arg3[%c1, %c0_32], %65 {strides = array<i32>} : memref<2x8xf32, #tpu.memory_space<vmem>>, vector<1x8xf32>,
    return
  }
  func.func @transform_0(%arg0: i32) -> (i32, i32) {
    %c0_i32 = arith.constant 0 : i32
    %c0_i32_0 = arith.constant 0 : i32
    %c0_i32_1 = arith.constant 0 : i32
    return %c0_i32, %c0_i32_0 : i32, i32
  }
  func.func @transform_1(%arg0: i32) -> (i32, i32) {
    %c0_i32 = arith.constant 0 : i32
    %c0_i32_0 = arith.constant 0 : i32
    %c0_i32_1 = arith.constant 0 : i32
    return %c0_i32, %c0_i32_0 : i32, i32
  }
  func.func @transform_2(%arg0: i32) -> (i32, i32) {
    %c0_i32 = arith.constant 0 : i32
    %c0_i32_0 = arith.constant 0 : i32
    %c0_i32_1 = arith.constant 0 : i32
    return %c0_i32, %c0_i32_0 : i32, i32
  }
}

</mosaic_0001>

<bundles_post_ra>
// kernel: tpu_custom_call.1
= control target key start
LH: loop header
LB: loop body
LE: loop exit
PB: predicated region body
PF: predicated region fallthrough
CT: control target
= control target key end

     0   :  { %7 = vsyncpa [#allocation3], 0  ;;  %s607_s0 = inlined_call_operand.hbm [shape: f32[8,17], index: 0, kind: input, shape index: {}]   ;;  %s608_s1 = inlined_call_operand.hbm [shape: f32[18,19], index: 1, kind: input, shape index: {}]   ;;  %s609_s2 = inlined_call_operand.hbm [shape: f32[2,8], index: 2, kind: output, shape index: {}]  }
   0x1   :  { %8 = vsyncpa [#allocation6], 0 }
   0x2   :  { %9 = vsyncpa [#allocation4], 0  ;;  %s535_s9 = smov [#allocation2]   ;;  %s536_s11 = smov [#allocation5]  }
   0x3   :  { %s16_s10 = sshll.u32 %s535_s9, 4  ;;  %s25_s12 = sshll.u32 %s536_s11, 4  ;;  %s17_s10 = int_to_ptr.vmem [resolvable:$true] %s16_s10  ;;  %s564_s12 = int_to_ptr.vmem [resolvable:$true] %s25_s12 }
   0x4   :  { %s463_s15 = scalar_lea.hbm %s607_s0, 128 }
   0x5   :  { %p464_p0 = scmp.ne.s32.totalorder %s607_s0, %s463_s15  ;;  %p467_p1 = scmp.lt.u32.totalorder %s463_s15, %s607_s0 }
   0x7   :  { %p469_p2 = pnand %p467_p1, %p464_p0 }
   0x9   :  { %472 = shalt.err (!%p469_p2)
}
   0xa   :  { %s473_s20 = scalar_lea.vmem %s17_s10, 128  ;;  %p478_p4 = scmp.lt.s32.totalorder %s17_s10, %s17_s10 }
   0xb   :  { %p474_p3 = scmp.ne.s32.totalorder %s17_s10, %s473_s20  ;;  %p479_p5 = scmp.lt.s32.totalorder %s473_s20, %s473_s20 }
   0xd   :  { %p480_p6 = por %p479_p5, %p478_p4 }
   0xf   :  { %p481_p7 = pnand %p480_p6, %p474_p3 }
  0x11   :  { %484 = shalt.err (!%p481_p7)
}
  0x12   :  { %19 = dma.hbm_to_vmem [thread:$0]  %s607_s0, 128, %s17_s10, [#allocation3]  }
  0x13   :  { %s485_s25 = scalar_lea.hbm %s608_s1, 384 }
  0x14   :  { %p486_p8 = scmp.ne.s32.totalorder %s608_s1, %s485_s25  ;;  %p489_p9 = scmp.lt.u32.totalorder %s485_s25, %s608_s1 }
  0x16   :  { %p491_p10 = pnand %p489_p9, %p486_p8 }
  0x18   :  { %494 = shalt.err (!%p491_p10)
}
  0x19   :  { %s495_s30 = scalar_lea.vmem %s564_s12, 384  ;;  %p500_p12 = scmp.lt.s32.totalorder %s564_s12, %s564_s12 }
  0x1a   :  { %p496_p11 = scmp.ne.s32.totalorder %s564_s12, %s495_s30  ;;  %p501_p13 = scmp.lt.s32.totalorder %s495_s30, %s495_s30 }
  0x1c   :  { %p502_p0 = por %p501_p13, %p500_p12 }
  0x1e   :  { %p503_p1 = pnand %p502_p0, %p496_p11 }
  0x20   :  { %506 = shalt.err (!%p503_p1)
}
  0x21   :  { %s537_s0 = smov 128   ;;  %s538_s3 = smov 8  }
  0x22   :  { %31 = dma.hbm_to_vmem [thread:$0]  %s608_s1, 384, %s564_s12, [#allocation6], %s537_s0, %s537_s0, %s538_s3  }
  0x23   :  { %529 = dma.done.wait [#allocation3], 128  }
  0x24   :  { %530 = vsyncadd [#allocation3], 4294967168 }
  0x25   :  { %531 = dma.done.wait [#allocation6], 384  }
  0x26   :  { %532 = vsyncadd [#allocation6], 4294966912  ;;  %vm43_vm0 = vcmask 138240   ;;  %v42_v0 = vld [vmem:[#allocation2] sm:$0xff]  ;;  %v38_v1 = vld [vmem:[#allocation5] sm:$0xff]  ;;  %vm128_vm1 = vcmask 64512  }
  0x27   :  { %411 = vmatprep.subr.msk.mxu0 %vm43_vm0, %v42_v0  ;;  %413 = vmatprep.mubr.msk.f32.mxu0 %vm43_vm0, %v38_v1  ;;  %v39_v2 = vld [vmem:[#allocation5 + $0x8] sm:$0x3]  ;;  %vm132_vm2 = vcmask 58368   ;;  %v539_v17 = vmov 17   ;;  %v540_v28 = vmov 18   ;;  %v541_v29 = vmov 0.0|0.0  }
  0x28   :  { %412 = vmatpush3.xpose.msk.msra.mxu0 %vm43_vm0, %v42_v0  ;;  %446 = vset.pattern.permute.xlu0 %v539_v17  ;;  %vm542_vm3 = vmmov 0   ;;  %v543_v30 = vmov 0.0   ;;  %vm184_vm4 = vcmask 1041408   ;;  %vm544_vm5 = vmmov 1   ;;  %v40_v42 = vld [vmem:[#allocation5 + $0xa] sm:$0x3f] }
  0x29   :  { %447 = vset.pattern.permute.xlu1 %v539_v17  ;;  %428 = vmatprep.subr.bf16.mxu1 %v541_v29  ;;  %vm430_vm6 = vmpackc.low %vm184_vm4, %vm544_vm5  ;;  %vm180_vm7 = vcmask 80896   ;;  %vm258_vm8 = vcmask 62464   ;;  %v545_v51 = vmov 10   ;;  %v546_v52 = vmov 11   ;;  %v41_v58 = vld [vmem:[#allocation5 + $0x10] sm:$0x3] }
  0x2a   :  { %420 = vmatprep.mubr.msk.f32.mxu1 %vm542_vm3, %v543_v30  ;;  %423 = vmatprep.subr.mxu0 %v543_v30  ;;  %v547_v59 = vmov 6   ;;  %vm292_vm9 = vcmask 1045504   ;;  %vm289_vm10 = vcmask 48128   ;;  %vm376_vm11 = vcmask 57344   ;;  %s548_s1 = smov [#allocation7]  }
  0x2b   :  { %414 = vmatmul.mubr.msk.f32.vlgmr.msra.gmra.mrb[0].mxu0 %vm43_vm0, %v39_v2  ;;  %s386_s6 = sshll.u32 %s548_s1, 4  ;;  %s387_s6 = int_to_ptr.vmem [resolvable:$true] %s386_s6 }
  0x2c   :  { %425 = vmatprep.mubr.msk.f32.mxu0 %vm542_vm3, %v543_v30  ;;  %s507_s7 = scalar_lea.vmem %s387_s6, 32  ;;  %p512_p3 = scmp.lt.s32.totalorder %s387_s6, %s387_s6 }
  0x2d   :  { %p508_p2 = scmp.ne.s32.totalorder %s387_s6, %s507_s7  ;;  %p513_p4 = scmp.lt.s32.totalorder %s507_s7, %s507_s7 }
  0x2f   :  { %p514_p5 = por %p513_p4, %p512_p3 }
  0x31   :  { %p515_p6 = pnand %p514_p5, %p508_p2 }
  0xfe   :  { %v415_v3 = vpop.f32.mrb[0].mxu0 }
  0xff   :  { %v119_v4 = vpop.f32.mrb[1].mxu0  ;;  %v133_v6 = vsel %vm132_vm2, %v415_v3, 0.0 }
 0x100   :  { %v129_v5 = vsel %vm128_vm1, %v119_v4, 0.0 }
 0x101   :  { %130 = vadd.xlane.f32.xlu0 %v129_v5 }
 0x105   :  { %134 = vadd.xlane.f32.xlu0 %v133_v6 }
 0x18e   :  { %v131_v7 = vpop.xlane.xlu0 %130 }
 0x18f   :  { %v136_v8 = vmul.f32 0.125, %v131_v7 }
 0x191   :  { %v138_v9 = vsub.f32 %v119_v4, %v136_v8 }
 0x192   :  { %v135_v10 = vpop.xlane.xlu0 %134 }
 0x193   :  { %v137_v11 = vmul.f32 0.125, %v135_v10  ;;  %v140_v12 = vmul.f32 %v138_v9, %v138_v9 }
 0x195   :  { %v139_v13 = vsub.f32 %v415_v3, %v137_v11  ;;  %v142_v14 = vsel %vm128_vm1, %v140_v12, 0.0 }
 0x196   :  { %143 = vadd.xlane.f32.xlu1 %v142_v14 }
 0x197   :  { %v141_v15 = vmul.f32 %v139_v13, %v139_v13 }
 0x199   :  { %v145_v16 = vsel %vm132_vm2, %v141_v15, 0.0 }
 0x19a   :  { %146 = vadd.xlane.f32.xlu1 %v145_v16 }
 0x223   :  { %v144_v18 = vpop.xlane.xlu1 %143 }
 0x224   :  { %v148_v19 = vmul.f32 0.125, %v144_v18 }
 0x226   :  { %v150_v20 = vadd.f32 1e-05, %v148_v19 }
 0x227   :  { %v147_v21 = vpop.xlane.xlu1 %146 }
 0x228   :  { %453 = vrsqrt.f32 %v150_v20  ;;  %v149_v22 = vmul.f32 0.125, %v147_v21 }
 0x22a   :  { %v151_v23 = vadd.f32 1e-05, %v149_v22 }
 0x22c   :  { %455 = vrsqrt.f32 %v151_v23 }
 0x232   :  { %v454_v24 = vpop.eup %453 }
 0x233   :  { %v154_v25 = vmul.f32 %v454_v24, %v38_v1 }
 0x235   :  { %158 = vperm.xlu0 %446, %v154_v25  }
 0x236   :  { %v456_v26 = vpop.eup %455 }
 0x237   :  { %v155_v27 = vmul.f32 %v456_v26, %v39_v2 }
 0x239   :  { %163 = vperm.xlu1 %447, %v155_v27   ;;  %450 = vset.pattern.permute.xlu0 %v546_v52 }
 0x23d   :  { %448 = vset.pattern.permute.xlu1 %v540_v28 }
 0x23e   :  { %169 = vperm.xlu1 %448, %v38_v1  }
 0x242   :  { %173 = vperm.xlu1 %448, %v39_v2  }
 0x246   :  { %449 = vset.pattern.permute.xlu1 %v545_v51 }
 0x2b4   :  { %v159_v32 = vpop.permute.xlu0 %158 }
 0x2b5   :  { %v166_v34 = vmul.f32 %v159_v32, %v138_v9 }
 0x2b8   :  { %v164_v31 = vpop.permute.xlu1 %163 }
 0x2b9   :  { %v167_v35 = vmul.f32 %v164_v31, %v139_v13 }
 0x2bd   :  { %v170_v33 = vpop.permute.xlu1 %169 }
 0x2be   :  { %v176_v36 = vadd.f32 %v170_v33, %v166_v34 }
 0x2c0   :  { %v178_v39 = vmax.f32 %v176_v36, 0.0 }
 0x2c1   :  { %v174_v37 = vpop.permute.xlu1 %173 }
 0x2c2   :  { %v177_v38 = vadd.f32 %v174_v37, %v167_v35 }
 0x2c4   :  { %v179_v40 = vmax.f32 %v177_v38, 0.0 }
 0x2c6   :  { %v429_v41 = vpack.c.bf16 %v179_v40, %v178_v39 }
 0x2c8   :  { %431 = vmatpush3.bf16.msk.msra.mxu1 %vm430_vm6, %v429_v41 }
 0x2cb   :  { %421 = vmatmul.mubr.msk.f32.vlgmr.msra.gmra.mrb[0].mxu1 %vm180_vm7, %v40_v42 }
 0x39e   :  { %v254_v43 = vpop.f32.mrb[0].mxu1 }
 0x39f   :  { %v422_v44 = vpop.f32.mrb[1].mxu1  ;;  %v259_v45 = vsel %vm258_vm8, %v254_v43, 0.0 }
 0x3a0   :  { %260 = vadd.xlane.f32.xlu1 %v259_v45 }
 0x42d   :  { %v261_v46 = vpop.xlane.xlu1 %260 }
 0x42e   :  { %v262_v47 = vmul.f32 0.125, %v261_v46 }
 0x430   :  { %v263_v48 = vsub.f32 %v254_v43, %v262_v47 }
 0x432   :  { %v264_v49 = vmul.f32 %v263_v48, %v263_v48 }
 0x434   :  { %v265_v50 = vsel %vm258_vm8, %v264_v49, 0.0 }
 0x435   :  { %266 = vadd.xlane.f32.xlu0 %v265_v50 }
 0x44b   :  { %279 = vperm.xlu0 %450, %v40_v42  }
 0x44f   :  { %452 = vset.pattern.permute.xlu0 %v547_v59 }
 0x4c2   :  { %v267_v53 = vpop.xlane.xlu0 %266 }
 0x4c3   :  { %v268_v54 = vmul.f32 0.125, %v267_v53 }
 0x4c5   :  { %v269_v55 = vadd.f32 1e-05, %v268_v54 }
 0x4c7   :  { %457 = vrsqrt.f32 %v269_v55 }
 0x4ca   :  { %v280_v61 = vpop.permute.xlu0 %279 }
 0x4d1   :  { %v458_v56 = vpop.eup %457 }
 0x4d2   :  { %v271_v57 = vmul.f32 %v458_v56, %v40_v42 }
 0x4d4   :  { %274 = vperm.xlu1 %449, %v271_v57  }
 0x4d8   :  { %451 = vset.pattern.permute.xlu1 %v547_v59 }
 0x4d9   :  { %286 = vperm.xlu1 %451, %v41_v58  }
 0x553   :  { %v275_v60 = vpop.permute.xlu1 %274 }
 0x554   :  { %v277_v62 = vmul.f32 %v275_v60, %v263_v48 }
 0x556   :  { %v282_v63 = vadd.f32 %v280_v61, %v277_v62 }
 0x558   :  { %v283_v0 = vmax.f32 %v282_v63, 0.0  ;;  %v287_v1 = vpop.permute.xlu1 %286 }
 0x55a   :  { %424 = vmatpush3.msk.msra.mxu0 %vm292_vm9, %v283_v0 }
 0x55b   :  { %426 = vmatmul.mubr.msk.f32.vlgmr.msra.gmra.mrb[2].mxu0 %vm289_vm10, %v41_v58 }
 0x62e   :  { %v362_v2 = vpop.f32.mrb[2].mxu0 }
 0x62f   :  { %v363_v3 = vadd.f32 %v362_v2, %v287_v1  ;;  %v427_v4 = vpop.f32.mrb[3].mxu0 }
 0x631   :  { %v367_v5 = vrot.slane %v363_v3, 1 }
 0x633   :  { %v369_v6 = vsub.f32 %v363_v3, %v367_v5 }
 0x635   :  { %v370_v7 = vsub.f32 0.0, %v369_v6 }
 0x637   :  { %v371_v8 = vmul.f32 1.442695, %v370_v7 }
 0x639   :  { %459 = vpow2.f32 %v371_v8 }
 0x643   :  { %v460_v9 = vpop.eup %459 }
 0x644   :  { %v373_v10 = vadd.f32 1.0, %v460_v9 }
 0x646   :  { %461 = vrcp.f32 %v373_v10 }
 0x650   :  { %v462_v11 = vpop.eup %461 }
 0x651   :  { %377 = vst.msk [vmem:[#allocation7] sm:$0x1] %vm376_vm11, %v462_v11  ;;  %v378_v12 = vsub.f32 1.0, %v462_v11 }
 0x653   :  { %379 = vst.msk [vmem:[#allocation7 + $0x1] sm:$0x1] %vm376_vm11, %v378_v12 }
 0x654   :  { %518 = shalt.err (!%p515_p6)
}
 0x655   :  { %s519_s10 = scalar_lea.hbm %s609_s2, 32 }
 0x656   :  { %p520_p7 = scmp.ne.s32.totalorder %s609_s2, %s519_s10  ;;  %p523_p8 = scmp.lt.u32.totalorder %s519_s10, %s609_s2 }
 0x658   :  { %p525_p9 = pnand %p523_p8, %p520_p7 }
 0x65a   :  { %528 = shalt.err (!%p525_p9)
}
 0x65b   :  { %389 = dma.vmem_to_hbm [thread:$0]  %s387_s6, 32, %s609_s2, [#allocation4]  }
 0x65c   :  { %533 = dma.done.wait [#allocation4], 32  }
 0x65d   :  { %534 = vsyncadd [#allocation4], 4294967264 }
 0x65e   :  { %393 = vsyncpa [#allocation3], 1 }
 0x65f   :  { %394 = vsyncpa [#allocation6], 1 }
 0x660   :  { %395 = vsyncpa [#allocation4], 1 }

</bundles_post_ra>
